<compile_context>
chip_gen: v7x
topology: tpu7x:2x2x1
jax: 0.10.0
libtpu: 0.0.40
codegen_flags: <defaults>
</compile_context>

<pallas_src>
import numpy as np
import jax
import jax.numpy as jnp
from jax.experimental import pallas as pl
from jax.experimental.pallas import tpu as pltpu

NEG_SLOPE = 0.01   # nn.LeakyReLU default negative_slope
EPS = 1e-5         # nn.BatchNorm2d default eps

# MXU-native operand dtype for the three matmuls (accumulation is always f32).
MATMUL_DTYPE = jnp.bfloat16
# Dense-net slab (VMEM scratch).  f32 keeps accumulation accuracy across depth;
# set to jnp.bfloat16 on v7x (64 MiB VMEM) to halve the dominant VMEM term.
SLAB_DTYPE = jnp.float32
ROW_ALIGN = 8 if jnp.dtype(SLAB_DTYPE).itemsize == 4 else 16


def _round_up(v, m):
    return (v + m - 1) // m * m


def _leaky(x):
    # max(x, a*x) == LeakyReLU(x) for 0 < a < 1: mul+max (2 VALU ops).
    return jnp.maximum(x, NEG_SLOPE * x)


# ------------------------------ fused kernel --------------------------------

def _make_fused_kernel(depth, r0p, grp):
    """Kernel body: the whole _DenseSpatialFilter forward on one lane tile."""

    def kernel(x_ref, *rest):
        params = rest[:-2]
        o_ref, slab = rest[-2], rest[-1]

        # Seed the dense-net slab with the (row-padded) input rows.
        slab[0:r0p, :] = x_ref[...].astype(SLAB_DTYPE)

        off = r0p
        for d in range(depth):                       # unrolled at trace time
            s1, t1, m1, b1, m2, b2 = params[6 * d:6 * d + 6]
            # BN1 (folded to per-row scale/shift) + LeakyReLU (padded rows: 0).
            a = _leaky(slab[0:off, :].astype(jnp.float32) * s1[...] + t1[...])
            # 1x1 conv (+bias) with BN2 pre-folded into (m1, b1), then LeakyReLU.
            # bf16 operands on the MXU, f32 accumulation.
            h = _leaky(jnp.dot(m1[...], a.astype(MATMUL_DTYPE),
                               preferred_element_type=jnp.float32) + b1[...])
            # (5,1) conv along electrodes == banded matmul; Dropout2d(p)=identity (eval).
            y = jnp.dot(m2[...], h.astype(MATMUL_DTYPE),
                        preferred_element_type=jnp.float32) + b2[...]
            # torch.cat((x, net(x)), dim=1) == write new growth rows below
            # (padded rows of m2/b2 are zero, so padded slab rows stay zero).
            slab[off:off + grp, :] = y.astype(SLAB_DTYPE)
            off += grp

        # channel_collapse: (n_chans,1) conv (no bias) -> LeakyReLU -> BN
        mc, sc, tc = params[6 * depth:6 * depth + 3]
        z = jnp.dot(mc[...], slab[...].astype(MATMUL_DTYPE),
                    preferred_element_type=jnp.float32)
        o_ref[...] = _leaky(z) * sc[...] + tc[...]

    return kernel


def _full_spec(p):
    return pl.BlockSpec(p.shape, lambda j: (0, 0))


def _choose_lane_block(n_pad, r_total_pad, slab_itemsize):
    """Largest 128-multiple lane tile that (a) divides n_pad, (b) leaves >=2 grid
    steps once n_pad >= 256 (so the 'parallel' grid axis shards across v7x's two
    TensorCores and the I/O DMA can pipeline), (c) keeps the slab under a
    conservative VMEM budget, and (d) is <= 512 lanes."""
    budget = 20 << 20
    best = 128
    for cand in range(128, min(n_pad, 512) + 1, 128):
        if n_pad % cand:
            continue
        if n_pad >= 256 and n_pad // cand < 2:
            continue
        if r_total_pad * cand * slab_itemsize > budget:
            continue
        best = cand
    return best


def _padded_vmem_bytes(p):
    r, c = p.shape
    return _round_up(r, 8) * _round_up(c, 128) * p.dtype.itemsize


def dense_spatial_filter_pallas(x, params, lane_block=None):
    """Mirrors _DenseSpatialFilter.forward (inference mode, collapse=True)."""
    meta = params["meta"]
    if x.ndim < 4:
        # x.unsqueeze(1).permute([0,1,3,2]): (B, T, n_chans) -> (B, 1, n_chans, T)
        x = jnp.transpose(x[:, None, :, :], (0, 1, 3, 2))
    x = x.astype(jnp.float32)
    B, c0, H, W = x.shape
    depth, r0, r0p, grp = meta["depth"], meta["r0"], meta["r0p"], meta["grp"]
    n_f, n_fp = meta["n_f"], meta["n_fp"]
    assert H == meta["H"] and c0 * H == r0
    r_total_pad = r0p + depth * grp
    assert params["Mc"].shape == (n_fp, r_total_pad)

    flat = []
    for L in params["layers_flat"]:
        flat += [L["s1"], L["t1"], L["M1"], L["b1"], L["M2"], L["b2"]]
    flat += [params["Mc"], params["sc"], params["tc"]]

    # rows = (feat_channel, electrode), lanes = (batch, time): lane-dense output.
    x_flat = jnp.transpose(x, (1, 2, 0, 3)).reshape(r0, B * W)
    N = B * W
    n_pad = _round_up(max(N, 128), 128)      # lane padding -> unmasked 128-lane stores
    slab_isz = jnp.dtype(SLAB_DTYPE).itemsize
    if lane_block is None:
        lane_block = _choose_lane_block(n_pad, r_total_pad, slab_isz)
    assert n_pad % lane_block == 0 and lane_block % 128 == 0
    x_flat = jnp.pad(x_flat, ((0, r0p - r0), (0, n_pad - N)))

    # Advisory cost hint for the XLA scheduler around the custom call.
    flops = 0
    for d in range(depth):
        cbh = params["layers_flat"][d]["M1"].shape[0]
        flops += 2 * cbh * (r0p + d * grp) + 2 * grp * cbh
    flops += 2 * n_fp * r_total_pad
    flops *= n_pad
    bytes_accessed = (r0p + n_fp) * n_pad * 4 + sum(
        int(np.prod(p.shape)) * p.dtype.itemsize for p in flat)

    # Scoped-VMEM limit: slab (single-buffered scratch) + double-buffered I/O
    # tiles + double-buffered lane-padded params, with 2x headroom; capped at
    # 64 MiB so it is safe on v7x, floored at the 32 MiB default.
    vmem_need = (r_total_pad * lane_block * slab_isz
                 + 2 * (r0p + n_fp) * lane_block * 4
                 + 2 * sum(_padded_vmem_bytes(p) for p in flat))
    vmem_limit = int(min(64 << 20, max(32 << 20, 2 * vmem_need)))

    out = pl.pallas_call(
        _make_fused_kernel(depth, r0p, grp),
        out_shape=jax.ShapeDtypeStruct((n_fp, n_pad), jnp.float32),
        grid=(n_pad // lane_block,),
        in_specs=[pl.BlockSpec((r0p, lane_block), lambda j: (0, j))]
                 + [_full_spec(p) for p in flat],
        out_specs=pl.BlockSpec((n_fp, lane_block), lambda j: (0, j)),
        scratch_shapes=[pltpu.VMEM((r_total_pad, lane_block), SLAB_DTYPE)],
        compiler_params=pltpu.CompilerParams(
            dimension_semantics=("parallel",),
            vmem_limit_bytes=vmem_limit),
        cost_estimate=pl.CostEstimate(flops=int(flops), transcendentals=0,
                                      bytes_accessed=int(bytes_accessed)),
    )(x_flat, *flat)

    # (n_fp, n_pad) -> strip row/lane padding -> (B, n_f, W).
    # (H was collapsed inside the matmul == squeeze(-2) in the torch module.)
    out = out[:n_f, :N]
    return jnp.transpose(out.reshape(n_f, B, W), (1, 0, 2))


# ------------------------- parameter construction ---------------------------

def _band_matrix(w2, H):
    """(G,C,K) conv weight with padding K//2 along H -> (G*H, C*H) banded matrix."""
    G, C, K = w2.shape
    pad = K // 2
    M = np.zeros((G * H, C * H), np.float32)
    for k in range(K):
        for h in range(H):
            hp = h + k - pad
            if 0 <= hp < H:
                M[np.arange(G)[:, None] * H + h,
                  np.arange(C)[None, :] * H + hp] = w2[:, :, k]
    return M


def _pad_rows(M, rows_to):
    if M.shape[0] == rows_to:
        return M
    pad = np.zeros((rows_to - M.shape[0],) + M.shape[1:], M.dtype)
    return np.concatenate([M, pad], axis=0)


def _pad_row_blocks(v, blk_u, blk_p):
    parts, c = [], 0
    for u, p in zip(blk_u, blk_p):
        parts.append(_pad_rows(v[c:c + u], p))
        c += u
    return np.concatenate(parts, axis=0)


def _pad_col_blocks(M, blk_u, blk_p):
    parts, c = [], 0
    for u, p in zip(blk_u, blk_p):
        part = M[:, c:c + u]
        if p > u:
            part = np.concatenate(
                [part, np.zeros((M.shape[0], p - u), M.dtype)], axis=1)
        parts.append(part)
        c += u
    return np.concatenate(parts, axis=1)


def make_params(n_chans, growth, depth, in_ch=1, bottleneck=4, seed=42):
    rng = np.random.default_rng(seed)
    H, K = n_chans, 5  # filter_len=5 (default) in _DenseFilter

    def bn_params(c):
        return dict(gamma=(1.0 + 0.1 * rng.standard_normal(c)).astype(np.float32),
                    beta=(0.1 * rng.standard_normal(c)).astype(np.float32),
                    mean=(0.1 * rng.standard_normal(c)).astype(np.float32),
                    var=(1.0 + 0.5 * rng.random(c)).astype(np.float32))

    def bn_scale_shift(bn):
        s = (bn["gamma"] / np.sqrt(bn["var"] + EPS)).astype(np.float32)
        t = (bn["beta"] - bn["mean"] * s).astype(np.float32)
        return s, t

    r0, grow = in_ch * H, growth * H
    r0p, grp = _round_up(r0, ROW_ALIGN), _round_up(grow, ROW_ALIGN)

    layers, layers_flat = [], []
    for d in range(depth):
        c_in = in_ch + growth * d
        cb = bottleneck * growth
        bn1 = bn_params(c_in)
        w1 = (rng.standard_normal((cb, c_in)) / np.sqrt(c_in)).astype(np.float32)
        b1 = (0.1 * rng.standard_normal(cb)).astype(np.float32)
        bn2 = bn_params(cb)
        w2 = (rng.standard_normal((growth, cb, K)) / np.sqrt(cb * K)).astype(np.float32)
        b2 = (0.1 * rng.standard_normal(growth)).astype(np.float32)
        layers.append(dict(bn1=bn1, W1=w1, b1=b1, bn2=bn2, W2=w2, b2=b2))

        s1, t1 = bn_scale_shift(bn1)
        s2, t2 = bn_scale_shift(bn2)
        # Fold BN2 and the 1x1-conv bias into the 1x1-conv matrix (exact):
        #   leaky(s2*(W1@a + b1) + t2) == leaky((s2 . W1)@a + (s2*b1 + t2))
        m1 = np.repeat(s2, H)[:, None] * np.kron(w1, np.eye(H, dtype=np.float32))
        b1f = np.repeat(s2 * b1 + t2, H)[:, None]
        m2 = _band_matrix(w2, H)

        # Sublane-align every slab row block (zero rows/cols are exact no-ops).
        blk_u = [r0] + [grow] * d
        blk_p = [r0p] + [grp] * d
        layers_flat.append(dict(
            s1=jnp.asarray(_pad_row_blocks(np.repeat(s1, H)[:, None], blk_u, blk_p),
                           jnp.float32),
            t1=jnp.asarray(_pad_row_blocks(np.repeat(t1, H)[:, None], blk_u, blk_p),
                           jnp.float32),
            M1=jnp.asarray(_pad_col_blocks(m1, blk_u, blk_p), MATMUL_DTYPE),
            b1=jnp.asarray(b1f, jnp.float32),
            M2=jnp.asarray(_pad_rows(m2, grp), MATMUL_DTYPE),
            b2=jnp.asarray(_pad_rows(np.repeat(b2, H)[:, None], grp), jnp.float32),
        ))

    n_f = in_ch + growth * depth
    n_fp = _round_up(n_f, ROW_ALIGN)
    wc = (rng.standard_normal((n_f, n_f, H)) / np.sqrt(n_f * H)).astype(np.float32)
    bnc = bn_params(n_f)
    sc, tc = bn_scale_shift(bnc)

    blk_u = [r0] + [grow] * depth
    blk_p = [r0p] + [grp] * depth
    mc = _pad_rows(_pad_col_blocks(wc.reshape(n_f, n_f * H), blk_u, blk_p), n_fp)

    meta = dict(H=H, depth=depth, r0=r0, r0p=r0p, grow=grow, grp=grp,
                n_f=n_f, n_fp=n_fp)
    return dict(layers=layers, layers_flat=layers_flat, Wc=wc, bnc=bnc,
                Mc=jnp.asarray(mc, MATMUL_DTYPE),
                sc=jnp.asarray(_pad_rows(sc[:, None], n_fp), jnp.float32),
                tc=jnp.asarray(_pad_rows(tc[:, None], n_fp), jnp.float32),
                meta=meta)


# ---------------------------- pure-JAX reference ----------------------------

def reference_forward(x, params):
    hp = jax.lax.Precision.HIGHEST
    if x.ndim < 4:
        x = jnp.transpose(x[:, None, :, :], (0, 1, 3, 2))
    h = x.astype(jnp.float32)

    def bn(y, p):
        s = p["gamma"] / np.sqrt(p["var"] + EPS)
        t = p["beta"] - p["mean"] * s
        return y * s[None, :, None, None] + t[None, :, None, None]

    def leaky(y):
        return jnp.where(y >= 0, y, NEG_SLOPE * y)

    for p in params["layers"]:
        y = leaky(bn(h, p["bn1"]))
        y = jnp.einsum("oi,bihw->bohw", p["W1"], y, precision=hp) \
            + p["b1"][None, :, None, None]
        y = leaky(bn(y, p["bn2"]))
        K = p["W2"].shape[-1]
        pad, Hh = K // 2, y.shape[2]
        yp = jnp.pad(y, ((0, 0), (0, 0), (pad, pad), (0, 0)))
        out = sum(jnp.einsum("oc,bchw->bohw", p["W2"][:, :, k],
                             yp[:, :, k:k + Hh, :], precision=hp)
                  for k in range(K)) + p["b2"][None, :, None, None]
        h = jnp.concatenate([h, out], axis=1)

    z = jnp.einsum("oih,bihw->bow", params["Wc"], h, precision=hp)
    z = leaky(z)
    s = params["bnc"]["gamma"] / np.sqrt(params["bnc"]["var"] + EPS)
    t = params["bnc"]["beta"] - params["bnc"]["mean"] * s
    return z * s[None, :, None] + t[None, :, None]


# ----------------------------------- main -----------------------------------

if __name__ == "__main__":
    n_chans, growth, depth, in_ch, bottleneck = 8, 4, 2, 1, 4
    B, T = 2, 128
    params = make_params(n_chans, growth, depth, in_ch, bottleneck)

    x = jax.random.normal(jax.random.PRNGKey(0), (B, T, n_chans), dtype=jnp.float32)

    out = jax.block_until_ready(dense_spatial_filter_pallas(x, params))
    assert out.shape == (B, in_ch + growth * depth, T), out.shape

    ref = np.asarray(reference_forward(x, params))
    # bf16 MXU operands (f32 accumulation): ~1-2% relative error over the stack.
    np.testing.assert_allclose(np.asarray(out), ref, rtol=3e-2, atol=3e-2)
    print("KERNEL_OK")
</pallas_src>

<mosaic_0001>
module attributes {stable_mosaic.version = 11 : i64} {
  func.func @kernel(%arg0: i32, %arg1: memref<8x128xf32, #tpu.memory_space<vmem>>, %arg2: memref<8x1xf32, #tpu.memory_space<vmem>>, %arg3: memref<8x1xf32, #tpu.memory_space<vmem>>, %arg4: memref<128x8xbf16, #tpu.memory_space<vmem>>, %arg5: memref<128x1xf32, #tpu.memory_space<vmem>>, %arg6: memref<32x128xbf16, #tpu.memory_space<vmem>>, %arg7: memref<32x1xf32, #tpu.memory_space<vmem>>, %arg8: memref<40x1xf32, #tpu.memory_space<vmem>>, %arg9: memref<40x1xf32, #tpu.memory_space<vmem>>, %arg10: memref<128x40xbf16, #tpu.memory_space<vmem>>, %arg11: memref<128x1xf32, #tpu.memory_space<vmem>>, %arg12: memref<32x128xbf16, #tpu.memory_space<vmem>>, %arg13: memref<32x1xf32, #tpu.memory_space<vmem>>, %arg14: memref<16x72xbf16, #tpu.memory_space<vmem>>, %arg15: memref<16x1xf32, #tpu.memory_space<vmem>>, %arg16: memref<16x1xf32, #tpu.memory_space<vmem>>, %arg17: memref<16x128xf32, #tpu.memory_space<vmem>>, %arg18: memref<72x128xf32, #tpu.memory_space<vmem>>) attributes {dimension_semantics = [#tpu.dimension_semantics<parallel>], iteration_bounds = array<i64: 2>, scalar_prefetch = 0 : i64, scratch_operands = 1 : i64, tpu.core_type = #tpu.core_type<tc>, window_params = [{transform_indices = @transform_0, window_bounds = array<i64: 8, 128>}, {pipeline_mode = #tpu.pipeline_mode<synchronous>, transform_indices = @transform_1, window_bounds = array<i64: 8, 1>}, {pipeline_mode = #tpu.pipeline_mode<synchronous>, transform_indices = @transform_2, window_bounds = array<i64: 8, 1>}, {pipeline_mode = #tpu.pipeline_mode<synchronous>, transform_indices = @transform_3, window_bounds = array<i64: 128, 8>}, {pipeline_mode = #tpu.pipeline_mode<synchronous>, transform_indices = @transform_4, window_bounds = array<i64: 128, 1>}, {pipeline_mode = #tpu.pipeline_mode<synchronous>, transform_indices = @transform_5, window_bounds = array<i64: 32, 128>}, {pipeline_mode = #tpu.pipeline_mode<synchronous>, transform_indices = @transform_6, window_bounds = array<i64: 32, 1>}, {pipeline_mode = #tpu.pipeline_mode<synchronous>, transform_indices = @transform_7, window_bounds = array<i64: 40, 1>}, {pipeline_mode = #tpu.pipeline_mode<synchronous>, transform_indices = @transform_8, window_bounds = array<i64: 40, 1>}, {pipeline_mode = #tpu.pipeline_mode<synchronous>, transform_indices = @transform_9, window_bounds = array<i64: 128, 40>}, {pipeline_mode = #tpu.pipeline_mode<synchronous>, transform_indices = @transform_10, window_bounds = array<i64: 128, 1>}, {pipeline_mode = #tpu.pipeline_mode<synchronous>, transform_indices = @transform_11, window_bounds = array<i64: 32, 128>}, {pipeline_mode = #tpu.pipeline_mode<synchronous>, transform_indices = @transform_12, window_bounds = array<i64: 32, 1>}, {pipeline_mode = #tpu.pipeline_mode<synchronous>, transform_indices = @transform_13, window_bounds = array<i64: 16, 72>}, {pipeline_mode = #tpu.pipeline_mode<synchronous>, transform_indices = @transform_14, window_bounds = array<i64: 16, 1>}, {pipeline_mode = #tpu.pipeline_mode<synchronous>, transform_indices = @transform_15, window_bounds = array<i64: 16, 1>}, {transform_indices = @transform_16, window_bounds = array<i64: 16, 128>}]} {
    %c0 = arith.constant 0 : index
    %c0_0 = arith.constant 0 : index
    %0 = vector.load %arg1[%c0, %c0_0] : memref<8x128xf32, #tpu.memory_space<vmem>>, vector<8x128xf32>
    %c0_1 = arith.constant 0 : index
    %c0_2 = arith.constant 0 : index
    %1 = vector.load %arg18[%c0_1, %c0_2] : memref<72x128xf32, #tpu.memory_space<vmem>>, vector<8x128xf32>
    tpu.vector_store %arg18[%c0_1, %c0_2], %0 {strides = array<i32>} : memref<72x128xf32, #tpu.memory_space<vmem>>, vector<8x128xf32>,
    %c0_3 = arith.constant 0 : index
    %c0_4 = arith.constant 0 : index
    %2 = vector.load %arg18[%c0_3, %c0_4] : memref<72x128xf32, #tpu.memory_space<vmem>>, vector<8x128xf32>
    %c0_5 = arith.constant 0 : index
    %c0_6 = arith.constant 0 : index
    %3 = vector.load %arg2[%c0_5, %c0_6] : memref<8x1xf32, #tpu.memory_space<vmem>>, vector<8x1xf32>
    %4 = vector.broadcast %3 : vector<8x1xf32> to vector<8x128xf32>
    %5 = arith.mulf %2, %4 : vector<8x128xf32>
    %c0_7 = arith.constant 0 : index
    %c0_8 = arith.constant 0 : index
    %6 = vector.load %arg3[%c0_7, %c0_8] : memref<8x1xf32, #tpu.memory_space<vmem>>, vector<8x1xf32>
    %7 = vector.broadcast %6 : vector<8x1xf32> to vector<8x128xf32>
    %8 = arith.addf %5, %7 : vector<8x128xf32>
    %cst = arith.constant 0.00999999977 : f32
    %9 = vector.broadcast %cst : f32 to vector<8x128xf32>
    %10 = arith.mulf %9, %8 : vector<8x128xf32>
    %11 = arith.maximumf %8, %10 : vector<8x128xf32>
    %c0_9 = arith.constant 0 : index
    %c0_10 = arith.constant 0 : index
    %12 = vector.load %arg4[%c0_9, %c0_10] : memref<128x8xbf16, #tpu.memory_space<vmem>>, vector<128x8xbf16>
    %13 = arith.truncf %11 : vector<8x128xf32> to vector<8x128xbf16>
    %cst_11 = arith.constant dense<0.000000e+00> : vector<128x128xf32>
    %14 = tpu.matmul %12, %13, %cst_11 {dimension_numbers = #tpu.dot_dimension_numbers<[1], [0], [0], [1], [0, 0, 1, 1], [], []>} : vector<128x8xbf16>, vector<8x128xbf16>, vector<128x128xf32> -> vector<128x128xf32>
    %c0_12 = arith.constant 0 : index
    %c0_13 = arith.constant 0 : index
    %15 = vector.load %arg5[%c0_12, %c0_13] : memref<128x1xf32, #tpu.memory_space<vmem>>, vector<128x1xf32>
    %16 = vector.broadcast %15 : vector<128x1xf32> to vector<128x128xf32>
    %17 = arith.addf %14, %16 : vector<128x128xf32>
    %cst_14 = arith.constant 0.00999999977 : f32
    %18 = vector.broadcast %cst_14 : f32 to vector<128x128xf32>
    %19 = arith.mulf %18, %17 : vector<128x128xf32>
    %20 = arith.maximumf %17, %19 : vector<128x128xf32>
    %c0_15 = arith.constant 0 : index
    %c0_16 = arith.constant 0 : index
    %21 = vector.load %arg6[%c0_15, %c0_16] : memref<32x128xbf16, #tpu.memory_space<vmem>>, vector<32x128xbf16>
    %22 = arith.truncf %20 : vector<128x128xf32> to vector<128x128xbf16>
    %cst_17 = arith.constant dense<0.000000e+00> : vector<32x128xf32>
    %23 = tpu.matmul %21, %22, %cst_17 {dimension_numbers = #tpu.dot_dimension_numbers<[1], [0], [0], [1], [0, 0, 1, 1], [], []>} : vector<32x128xbf16>, vector<128x128xbf16>, vector<32x128xf32> -> vector<32x128xf32>
    %c0_18 = arith.constant 0 : index
    %c0_19 = arith.constant 0 : index
    %24 = vector.load %arg7[%c0_18, %c0_19] : memref<32x1xf32, #tpu.memory_space<vmem>>, vector<32x1xf32>
    %25 = vector.broadcast %24 : vector<32x1xf32> to vector<32x128xf32>
    %26 = arith.addf %23, %25 : vector<32x128xf32>
    %c8 = arith.constant 8 : index
    %c0_20 = arith.constant 0 : index
    %27 = vector.load %arg18[%c8, %c0_20] : memref<72x128xf32, #tpu.memory_space<vmem>>, vector<32x128xf32>
    tpu.vector_store %arg18[%c8, %c0_20], %26 {strides = array<i32>} : memref<72x128xf32, #tpu.memory_space<vmem>>, vector<32x128xf32>,
    %c0_21 = arith.constant 0 : index
    %c0_22 = arith.constant 0 : index
    %28 = vector.load %arg18[%c0_21, %c0_22] : memref<72x128xf32, #tpu.memory_space<vmem>>, vector<40x128xf32>
    %c0_23 = arith.constant 0 : index
    %c0_24 = arith.constant 0 : index
    %29 = vector.load %arg8[%c0_23, %c0_24] : memref<40x1xf32, #tpu.memory_space<vmem>>, vector<40x1xf32>
    %30 = vector.broadcast %29 : vector<40x1xf32> to vector<40x128xf32>
    %31 = arith.mulf %28, %30 : vector<40x128xf32>
    %c0_25 = arith.constant 0 : index
    %c0_26 = arith.constant 0 : index
    %32 = vector.load %arg9[%c0_25, %c0_26] : memref<40x1xf32, #tpu.memory_space<vmem>>, vector<40x1xf32>
    %33 = vector.broadcast %32 : vector<40x1xf32> to vector<40x128xf32>
    %34 = arith.addf %31, %33 : vector<40x128xf32>
    %cst_27 = arith.constant 0.00999999977 : f32
    %35 = vector.broadcast %cst_27 : f32 to vector<40x128xf32>
    %36 = arith.mulf %35, %34 : vector<40x128xf32>
    %37 = arith.maximumf %34, %36 : vector<40x128xf32>
    %c0_28 = arith.constant 0 : index
    %c0_29 = arith.constant 0 : index
    %38 = vector.load %arg10[%c0_28, %c0_29] : memref<128x40xbf16, #tpu.memory_space<vmem>>, vector<128x40xbf16>
    %39 = arith.truncf %37 : vector<40x128xf32> to vector<40x128xbf16>
    %cst_30 = arith.constant dense<0.000000e+00> : vector<128x128xf32>
    %40 = tpu.matmul %38, %39, %cst_30 {dimension_numbers = #tpu.dot_dimension_numbers<[1], [0], [0], [1], [0, 0, 1, 1], [], []>} : vector<128x40xbf16>, vector<40x128xbf16>, vector<128x128xf32> -> vector<128x128xf32>
    %c0_31 = arith.constant 0 : index
    %c0_32 = arith.constant 0 : index
    %41 = vector.load %arg11[%c0_31, %c0_32] : memref<128x1xf32, #tpu.memory_space<vmem>>, vector<128x1xf32>
    %42 = vector.broadcast %41 : vector<128x1xf32> to vector<128x128xf32>
    %43 = arith.addf %40, %42 : vector<128x128xf32>
    %cst_33 = arith.constant 0.00999999977 : f32
    %44 = vector.broadcast %cst_33 : f32 to vector<128x128xf32>
    %45 = arith.mulf %44, %43 : vector<128x128xf32>
    %46 = arith.maximumf %43, %45 : vector<128x128xf32>
    %c0_34 = arith.constant 0 : index
    %c0_35 = arith.constant 0 : index
    %47 = vector.load %arg12[%c0_34, %c0_35] : memref<32x128xbf16, #tpu.memory_space<vmem>>, vector<32x128xbf16>
    %48 = arith.truncf %46 : vector<128x128xf32> to vector<128x128xbf16>
    %cst_36 = arith.constant dense<0.000000e+00> : vector<32x128xf32>
    %49 = tpu.matmul %47, %48, %cst_36 {dimension_numbers = #tpu.dot_dimension_numbers<[1], [0], [0], [1], [0, 0, 1, 1], [], []>} : vector<32x128xbf16>, vector<128x128xbf16>, vector<32x128xf32> -> vector<32x128xf32>
    %c0_37 = arith.constant 0 : index
    %c0_38 = arith.constant 0 : index
    %50 = vector.load %arg13[%c0_37, %c0_38] : memref<32x1xf32, #tpu.memory_space<vmem>>, vector<32x1xf32>
    %51 = vector.broadcast %50 : vector<32x1xf32> to vector<32x128xf32>
    %52 = arith.addf %49, %51 : vector<32x128xf32>
    %c40 = arith.constant 40 : index
    %c0_39 = arith.constant 0 : index
    %53 = vector.load %arg18[%c40, %c0_39] : memref<72x128xf32, #tpu.memory_space<vmem>>, vector<32x128xf32>
    tpu.vector_store %arg18[%c40, %c0_39], %52 {strides = array<i32>} : memref<72x128xf32, #tpu.memory_space<vmem>>, vector<32x128xf32>,
    %c0_40 = arith.constant 0 : index
    %c0_41 = arith.constant 0 : index
    %54 = vector.load %arg14[%c0_40, %c0_41] : memref<16x72xbf16, #tpu.memory_space<vmem>>, vector<16x72xbf16>
    %c0_42 = arith.constant 0 : index
    %c0_43 = arith.constant 0 : index
    %55 = vector.load %arg18[%c0_42, %c0_43] : memref<72x128xf32, #tpu.memory_space<vmem>>, vector<72x128xf32>
    %56 = arith.truncf %55 : vector<72x128xf32> to vector<72x128xbf16>
    %cst_44 = arith.constant dense<0.000000e+00> : vector<16x128xf32>
    %57 = tpu.matmul %54, %56, %cst_44 {dimension_numbers = #tpu.dot_dimension_numbers<[1], [0], [0], [1], [0, 0, 1, 1], [], []>} : vector<16x72xbf16>, vector<72x128xbf16>, vector<16x128xf32> -> vector<16x128xf32>
    %cst_45 = arith.constant 0.00999999977 : f32
    %58 = vector.broadcast %cst_45 : f32 to vector<16x128xf32>
    %59 = arith.mulf %58, %57 : vector<16x128xf32>
    %60 = arith.maximumf %57, %59 : vector<16x128xf32>
    %c0_46 = arith.constant 0 : index
    %c0_47 = arith.constant 0 : index
    %61 = vector.load %arg15[%c0_46, %c0_47] : memref<16x1xf32, #tpu.memory_space<vmem>>, vector<16x1xf32>
    %62 = vector.broadcast %61 : vector<16x1xf32> to vector<16x128xf32>
    %63 = arith.mulf %60, %62 : vector<16x128xf32>
    %c0_48 = arith.constant 0 : index
    %c0_49 = arith.constant 0 : index
    %64 = vector.load %arg16[%c0_48, %c0_49] : memref<16x1xf32, #tpu.memory_space<vmem>>, vector<16x1xf32>
    %65 = vector.broadcast %64 : vector<16x1xf32> to vector<16x128xf32>
    %66 = arith.addf %63, %65 : vector<16x128xf32>
    %c0_50 = arith.constant 0 : index
    %c0_51 = arith.constant 0 : index
    %67 = vector.load %arg17[%c0_50, %c0_51] : memref<16x128xf32, #tpu.memory_space<vmem>>, vector<16x128xf32>
    tpu.vector_store %arg17[%c0_50, %c0_51], %66 {strides = array<i32>} : memref<16x128xf32, #tpu.memory_space<vmem>>, vector<16x128xf32>,
    return
  }
  func.func @transform_0(%arg0: i32) -> (i32, i32) {
    %c0_i32 = arith.constant 0 : i32
    %c0_i32_0 = arith.constant 0 : i32
    return %c0_i32, %arg0 : i32, i32
  }
  func.func @transform_1(%arg0: i32) -> (i32, i32) {
    %c0_i32 = arith.constant 0 : i32
    %c0_i32_0 = arith.constant 0 : i32
    %c0_i32_1 = arith.constant 0 : i32
    return %c0_i32, %c0_i32_0 : i32, i32
  }
  func.func @transform_2(%arg0: i32) -> (i32, i32) {
    %c0_i32 = arith.constant 0 : i32
    %c0_i32_0 = arith.constant 0 : i32
    %c0_i32_1 = arith.constant 0 : i32
    return %c0_i32, %c0_i32_0 : i32, i32
  }
  func.func @transform_3(%arg0: i32) -> (i32, i32) {
    %c0_i32 = arith.constant 0 : i32
    %c0_i32_0 = arith.constant 0 : i32
    %c0_i32_1 = arith.constant 0 : i32
    return %c0_i32, %c0_i32_0 : i32, i32
  }
  func.func @transform_4(%arg0: i32) -> (i32, i32) {
    %c0_i32 = arith.constant 0 : i32
    %c0_i32_0 = arith.constant 0 : i32
    %c0_i32_1 = arith.constant 0 : i32
    return %c0_i32, %c0_i32_0 : i32, i32
  }
  func.func @transform_5(%arg0: i32) -> (i32, i32) {
    %c0_i32 = arith.constant 0 : i32
    %c0_i32_0 = arith.constant 0 : i32
    %c0_i32_1 = arith.constant 0 : i32
    return %c0_i32, %c0_i32_0 : i32, i32
  }
  func.func @transform_6(%arg0: i32) -> (i32, i32) {
    %c0_i32 = arith.constant 0 : i32
    %c0_i32_0 = arith.constant 0 : i32
    %c0_i32_1 = arith.constant 0 : i32
    return %c0_i32, %c0_i32_0 : i32, i32
  }
  func.func @transform_7(%arg0: i32) -> (i32, i32) {
    %c0_i32 = arith.constant 0 : i32
    %c0_i32_0 = arith.constant 0 : i32
    %c0_i32_1 = arith.constant 0 : i32
    return %c0_i32, %c0_i32_0 : i32, i32
  }
  func.func @transform_8(%arg0: i32) -> (i32, i32) {
    %c0_i32 = arith.constant 0 : i32
    %c0_i32_0 = arith.constant 0 : i32
    %c0_i32_1 = arith.constant 0 : i32
    return %c0_i32, %c0_i32_0 : i32, i32
  }
  func.func @transform_9(%arg0: i32) -> (i32, i32) {
    %c0_i32 = arith.constant 0 : i32
    %c0_i32_0 = arith.constant 0 : i32
    %c0_i32_1 = arith.constant 0 : i32
    return %c0_i32, %c0_i32_0 : i32, i32
  }
  func.func @transform_10(%arg0: i32) -> (i32, i32) {
    %c0_i32 = arith.constant 0 : i32
    %c0_i32_0 = arith.constant 0 : i32
    %c0_i32_1 = arith.constant 0 : i32
    return %c0_i32, %c0_i32_0 : i32, i32
  }
  func.func @transform_11(%arg0: i32) -> (i32, i32) {
    %c0_i32 = arith.constant 0 : i32
    %c0_i32_0 = arith.constant 0 : i32
    %c0_i32_1 = arith.constant 0 : i32
    return %c0_i32, %c0_i32_0 : i32, i32
  }
  func.func @transform_12(%arg0: i32) -> (i32, i32) {
    %c0_i32 = arith.constant 0 : i32
    %c0_i32_0 = arith.constant 0 : i32
    %c0_i32_1 = arith.constant 0 : i32
    return %c0_i32, %c0_i32_0 : i32, i32
  }
  func.func @transform_13(%arg0: i32) -> (i32, i32) {
    %c0_i32 = arith.constant 0 : i32
    %c0_i32_0 = arith.constant 0 : i32
    %c0_i32_1 = arith.constant 0 : i32
    return %c0_i32, %c0_i32_0 : i32, i32
  }
  func.func @transform_14(%arg0: i32) -> (i32, i32) {
    %c0_i32 = arith.constant 0 : i32
    %c0_i32_0 = arith.constant 0 : i32
    %c0_i32_1 = arith.constant 0 : i32
    return %c0_i32, %c0_i32_0 : i32, i32
  }
  func.func @transform_15(%arg0: i32) -> (i32, i32) {
    %c0_i32 = arith.constant 0 : i32
    %c0_i32_0 = arith.constant 0 : i32
    %c0_i32_1 = arith.constant 0 : i32
    return %c0_i32, %c0_i32_0 : i32, i32
  }
  func.func @transform_16(%arg0: i32) -> (i32, i32) {
    %c0_i32 = arith.constant 0 : i32
    %c0_i32_0 = arith.constant 0 : i32
    return %c0_i32, %arg0 : i32, i32
  }
}

</mosaic_0001>

<bundles_post_ra>
// kernel: tpu_custom_call.1
= control target key start
LH: loop header
LB: loop body
LE: loop exit
PB: predicated region body
PF: predicated region fallthrough
CT: control target
= control target key end

     0   :  { %s2409_s0 = inlined_call_operand.vmem [shape: f32[8,256], index: 0, kind: input, shape index: {}]   ;;  %s2410_s1 = inlined_call_operand.vmem [shape: f32[8,1], index: 1, kind: input, shape index: {}]   ;;  %s2411_s2 = inlined_call_operand.vmem [shape: f32[8,1], index: 2, kind: input, shape index: {}]   ;;  %s2412_s3 = inlined_call_operand.vmem [shape: bf16[128,8], index: 3, kind: input, shape index: {}]   ;;  %s2413_s4 = inlined_call_operand.vmem [shape: f32[128,1], index: 4, kind: input, shape index: {}]   ;;  %s2414_s5 = inlined_call_operand.vmem [shape: bf16[32,128], index: 5, kind: input, shape index: {}]   ;;  %s2415_s6 = inlined_call_operand.vmem [shape: f32[32,1], index: 6, kind: input, shape index: {}]   ;;  %s2416_s7 = inlined_call_operand.vmem [shape: f32[40,1], index: 7, kind: input, shape index: {}]   ;;  %s2417_s8 = inlined_call_operand.vmem [shape: f32[40,1], index: 8, kind: input, shape index: {}]   ;;  %s2418_s9 = inlined_call_operand.vmem [shape: bf16[128,40], index: 9, kind: input, shape index: {}]   ;;  %s2419_s10 = inlined_call_operand.vmem [shape: f32[128,1], index: 10, kind: input, shape index: {}]   ;;  %s2420_s11 = inlined_call_operand.vmem [shape: bf16[32,128], index: 11, kind: input, shape index: {}]   ;;  %s2421_s12 = inlined_call_operand.vmem [shape: f32[32,1], index: 12, kind: input, shape index: {}]   ;;  %s2422_s13 = inlined_call_operand.vmem [shape: bf16[16,72], index: 13, kind: input, shape index: {}]   ;;  %s2423_s14 = inlined_call_operand.vmem [shape: f32[16,1], index: 14, kind: input, shape index: {}]   ;;  %s2424_s15 = inlined_call_operand.vmem [shape: f32[16,1], index: 15, kind: input, shape index: {}]   ;;  %s2425_s16 = inlined_call_operand.hbm [shape: f32[16,256], index: 16, kind: output, shape index: {}]  }
   0x1   :  { %2429 = sst [smem:[#allocation9_spill]] %s2409_s0 }
   0x2   :  { %2430 = sst [smem:[#allocation10_spill]] %s2410_s1 }
   0x3   :  { %2431 = sst [smem:[#allocation11_spill]] %s2411_s2 }
   0x4   :  { %21 = vsyncpa [#allocation4], 0 }
   0x5   :  { %23 = vsyncpa [#allocation4 + $0x1], 0  ;;  %s2039_s21 = smov 0   ;;  %s2041_s22 = smov 0  }
   0x6   :  { %s2043_s23 = smov 0   ;;  %s2045_s24 = smov 0  }
   0x7 LB: > { %2432 = sst [smem:[#allocation6_spill]] %s1941_s23  ;;  %s2060_s25 = sadd.s32 4294967295, %s1945_s24   ;;  %s1945_s24 = sphi %s2045_s24, %s2440_s24   ;;  %s1941_s23 = sphi %s2043_s23, %s2442_s23   ;;  %s1937_s22 = sphi %s2041_s22, %s2444_s22   ;;  %s1933_s21 = sphi %s2039_s21, %s2443_s21  }
   0x8   : > { %s1625_s26 = sadd.s32 4294967294, %s1945_s24   ;;  %s2064_s27 = sadd.s32 1, %s1945_s24  }
   0x9   : > { %2433 = sst [smem:[#allocation7_spill]] %s2064_s27  ;;  %s377_s28 = sadd.s32 1, %s1941_s23 }
   0xa   : > { %s374_s29 = ssub.s32 %s1945_s24, %s2064_s27  ;;  %p387_p0 = scmp.ne.s32.totalorder %s1941_s23, %s1937_s22 }
   0xb   : > { %p375_p1 = scmp.eq.s32.totalorder %s374_s29, 0  ;;  %p388_p2 = scmp.eq.s32.totalorder %s2060_s25, 1 }
   0xc   : > { %p393_p3 = scmp.ne.s32.totalorder %s1937_s22, %s1933_s21  ;;  %p394_p4 = scmp.eq.s32.totalorder %s1625_s26, 1 }
   0xd   : > { %s2075_s30 = scalar_select %p375_p1, %s1941_s23, %s377_s28  }
   0xe   : > { %p2077_p5 = por %p388_p2, %p387_p0  ;;  %p2081_p6 = por %p394_p4, %p393_p3 }
   0xf   : > { %2434 = sst [smem:[#allocation8_spill]] %s2075_s30  ;;  %p1628_p7 = scmp.ge.s32.totalorder %s1945_s24, 1 }
  0x10   : > { %p464_p8 = scmp.lt.s32.totalorder %s1945_s24, 3 }
  0x12   : > { %p465_p9 = pnand %p1628_p7, %p464_p8 }
  0x13   : > { %s2437_s1 = sld [smem:[#allocation10_spill]] (!%p465_p9)  ;;  %v1947_v1 = vmov (!%p465_p9), 0   ;;  %s2438_s2 = sld [smem:[#allocation11_spill]] (!%p465_p9)  ;;  %v556_v3 = vld [vmem:[%s2413_s4 + $0x10] sm:$0xff] (!%p465_p9)  ;;  %v554_v4 = vld [vmem:[%s2413_s4] sm:$0xff] (!%p465_p9)  ;;  %v555_v6 = vld [vmem:[%s2413_s4 + $0x8] sm:$0xff] (!%p465_p9) }
  0x14   : > { %468 = sbr.rel (%p465_p9) target bundleno = 1383 (0x567), region = 84  ;;  %1860 = vset.pattern.permute.xlu0 (!%p465_p9), %v1947_v1  ;;  %1861 = vset.pattern.permute.xlu1 (!%p465_p9), %v1947_v1  ;;  %v558_v5 = vld [vmem:[%s2413_s4 + $0x20] sm:$0xff] (!%p465_p9)  ;;  %v560_v7 = vld [vmem:[%s2413_s4 + $0x30] sm:$0xff] (!%p465_p9)  ;;  %v557_v8 = vld [vmem:[%s2413_s4 + $0x18] sm:$0xff] (!%p465_p9)  ;;  %vm690_vm0 = vcmask (!%p465_p9), 64512   ;;  %p513_p10 = scmp.lt.s32.totalorder (!%p465_p9), %s2060_s25, 1 }
  0x15   : > { %572 = vperm.xlu1 (!%p465_p9), %1861, %v554_v4   ;;  %v1862_v9 = vld [vmem:[%s2412_s3] sm:$0xff] (!%p465_p9)   ;;  %v559_v11 = vld [vmem:[%s2413_s4 + $0x28] sm:$0xff] (!%p465_p9)  ;;  %v564_v12 = vld [vmem:[%s2413_s4 + $0x50] sm:$0xff] (!%p465_p9)  ;;  %vm715_vm1 = vcmask (!%p465_p9), 1043456   ;;  %vm1189_vm2 = vcmask (!%p465_p9), 326656   ;;  %vm1949_vm3 = vmmov (!%p465_p9), 0  }
  0x16   : > { %v562_v10 = vld [vmem:[%s2413_s4 + $0x40] sm:$0xff] (!%p465_p9)  ;;  %1721 = vmatprep.mubr.msk.bf16.mxu0 (!%p465_p9), %vm690_vm0, %v1862_v9  ;;  %v561_v13 = vld [vmem:[%s2413_s4 + $0x38] sm:$0xff] (!%p465_p9)  ;;  %v563_v15 = vld [vmem:[%s2413_s4 + $0x48] sm:$0xff] (!%p465_p9)  ;;  %vm1468_vm4 = vcmask (!%p465_p9), 588800   ;;  %s1670_s19 = sshll.u32 (!%p465_p9), %s2060_s25, 7  ;;  %s1950_s26 = smov (!%p465_p9), [#allocation3]  }
  0x17   : > { %v566_v14 = vld [vmem:[%s2413_s4 + $0x60] sm:$0xff] (!%p465_p9)  ;;  %v568_v16 = vld [vmem:[%s2413_s4 + $0x70] sm:$0xff] (!%p465_p9)  ;;  %v565_v17 = vld [vmem:[%s2413_s4 + $0x58] sm:$0xff] (!%p465_p9)  ;;  %s2366_s27 = scalar_lea.hbm (!%p465_p9), %s2425_s16, %s1670_s19 }
  0x18   : > { %v860_v18 = vld [vmem:[%s2415_s6] sm:$0xff] (!%p465_p9)  ;;  %v567_v19 = vld [vmem:[%s2413_s4 + $0x68] sm:$0xff] (!%p465_p9)  ;;  %v569_v21 = vld [vmem:[%s2413_s4 + $0x78] sm:$0xff] (!%p465_p9) }
  0x19   : > { %v521_v0 = vld [vmem:[%s2437_s1] sm:$0xff] (!%p465_p9)  ;;  %577 = vperm.xlu1 (!%p465_p9), %1861, %v555_v6   ;;  %v955_v20 = vld [vmem:[%s2416_s7 + $0x8] sm:$0xff] (!%p465_p9)  ;;  %v862_v22 = vld [vmem:[%s2415_s6 + $0x10] sm:$0xff] (!%p465_p9) }
  0x1a   : > { %524 = vperm.xlu0 (!%p465_p9), %1860, %v521_v0   ;;  %v528_v2 = vld [vmem:[%s2438_s2] sm:$0xff] (!%p465_p9)  ;;  %v990_v24 = vld [vmem:[%s2417_s8 + $0x8] sm:$0xff] (!%p465_p9)  ;;  %v957_v26 = vld [vmem:[%s2416_s7 + $0x18] sm:$0xff] (!%p465_p9)  ;;  %s2439_s2 = sld [smem:[#allocation9_spill]] (!%p465_p9) }
  0x1b   : > { %v954_v23 = vld [vmem:[%s2416_s7] sm:$0xff]  ;;  %v861_v25 = vld [vmem:[%s2415_s6 + $0x8] sm:$0xff]  ;;  %v991_v28 = vld [vmem:[%s2417_s8 + $0x10] sm:$0xff]  ;;  %s514_s28 = scalar_select %p513_p10, %s2060_s25, 1 }
  0x1c   : > { %v989_v27 = vld [vmem:[%s2417_s8] sm:$0xff]  ;;  %v956_v29 = vld [vmem:[%s2416_s7 + $0x10] sm:$0xff]  ;;  %v863_v31 = vld [vmem:[%s2415_s6 + $0x18] sm:$0xff] }
  0x1d   : > { %587 = vperm.xlu1 %1861, %v557_v8   ;;  %v958_v30 = vld [vmem:[%s2416_s7 + $0x20] sm:$0xff]  ;;  %v992_v33 = vld [vmem:[%s2417_s8 + $0x18] sm:$0xff]  ;;  %v1055_v34 = vld [vmem:[%s2419_s10 + $0x10] sm:$0xff]  ;;  %s1630_s29 = sshll.u32 %s514_s28, 3  ;;  %s1887_s28 = sshll.u32 %s1950_s26, 4  ;;  %s1888_s28 = int_to_ptr.vmem [resolvable:$false] %s1887_s28 }
  0x1e   : > { %531 = vperm.xlu0 %1860, %v528_v2   ;;  %v1053_v32 = vld [vmem:[%s2419_s10] sm:$0xff]  ;;  %v1054_v37 = vld [vmem:[%s2419_s10 + $0x8] sm:$0xff]  ;;  %v1059_v38 = vld [vmem:[%s2419_s10 + $0x30] sm:$0xff] }
  0x1f   : > { %v993_v35 = vld [vmem:[%s2417_s8 + $0x20] sm:$0xff]  ;;  %v1056_v39 = vld [vmem:[%s2419_s10 + $0x18] sm:$0xff]  ;;  %v1058_v41 = vld [vmem:[%s2419_s10 + $0x28] sm:$0xff] }
  0x20   : > { %v1057_v36 = vld [vmem:[%s2419_s10 + $0x20] sm:$0xff]  ;;  %v1063_v42 = vld [vmem:[%s2419_s10 + $0x50] sm:$0xff]  ;;  %v1060_v43 = vld [vmem:[%s2419_s10 + $0x38] sm:$0xff]  ;;  %s516_s18 = scalar_lea.vmem %s2439_s2, %s1630_s29  ;;  %s510_s29 = sand.u32 1, %s1937_s22  }
  0x21   : > { %597 = vperm.xlu1 %1861, %v559_v11   ;;  %v1061_v40 = vld [vmem:[%s2419_s10 + $0x40] sm:$0xff]  ;;  %v1062_v45 = vld [vmem:[%s2419_s10 + $0x48] sm:$0xff]  ;;  %v1067_v46 = vld [vmem:[%s2419_s10 + $0x70] sm:$0xff]  ;;  %s1629_s23 = sshll.u32 %s510_s29, 4  ;;  %s2368_s20 = scalar_lea.sflag [#allocation4], %s510_s29 }
  0x22   : > { %582 = vperm.xlu0 %1860, %v556_v3   ;;  %v1065_v44 = vld [vmem:[%s2419_s10 + $0x60] sm:$0xff]  ;;  %v1064_v47 = vld [vmem:[%s2419_s10 + $0x58] sm:$0xff]  ;;  %v1066_v49 = vld [vmem:[%s2419_s10 + $0x68] sm:$0xff]  ;;  %s512_s30 = scalar_lea.vmem [#allocation3], %s1629_s23  ;;  %s1889_s23 = scalar_lea.vmem %s1888_s28, 512 }
  0x23   : > { %v1358_v48 = vld [vmem:[%s2421_s12] sm:$0xff]  ;;  %v1360_v50 = vld [vmem:[%s2421_s12 + $0x10] sm:$0xff]  ;;  %v1068_v51 = vld [vmem:[%s2419_s10 + $0x78] sm:$0xff] }
  0x24   : > { %v1520_v52 = vld [vmem:[%s2423_s14] sm:$0xff]  ;;  %v1359_v53 = vld [vmem:[%s2421_s12 + $0x8] sm:$0xff]  ;;  %v1361_v55 = vld [vmem:[%s2421_s12 + $0x18] sm:$0xff] }
  0x25   : > { %607 = vperm.xlu1 %1861, %v561_v13   ;;  %v1534_v54 = vld [vmem:[%s2424_s15] sm:$0xff]  ;;  %v1521_v56 = vld [vmem:[%s2423_s14 + $0x8] sm:$0xff]  ;;  %v1864_v4 = vld [vmem:[%s2412_s3 + $0x10] sm:$0xff]  }
  0x26   : > { %592 = vperm.xlu0 %1860, %v558_v5   ;;  %v1535_v57 = vld [vmem:[%s2424_s15 + $0x8] sm:$0xff]  ;;  %v2264_v59 = vld [vmem:[%s516_s18] sm:$0xff]  ;;  %v1865_v5 = vld [vmem:[%s2412_s3 + $0x18] sm:$0xff]   ;;  %s1563_s18 = sshll.u32 %s512_s30, 4  ;;  %s2361_s18 = int_to_ptr.vmem [resolvable:$true] %s1563_s18 }
  0x27   : > { %v1863_v3 = vld [vmem:[%s2412_s3 + $0x8] sm:$0xff]   ;;  %v1866_v6 = vld [vmem:[%s2412_s3 + $0x20] sm:$0xff]   ;;  %v1868_v8 = vld [vmem:[%s2412_s3 + $0x30] sm:$0xff]   ;;  %s1883_s25 = scalar_lea.vmem %s2361_s18, 256  ;;  %p1890_p0 = scmp.lt.s32.totalorder %s2361_s18, %s1888_s28 }
  0x28   : > { %v1869_v9 = vld [vmem:[%s2412_s3 + $0x38] sm:$0xff]   ;;  %p1884_p11 = scmp.ne.s32.totalorder %s2361_s18, %s1883_s25  ;;  %p1891_p1 = scmp.lt.s32.totalorder %s1889_s23, %s1883_s25 }
  0x29   : > { %617 = vperm.xlu1 %1861, %v563_v15  }
  0x2a   : > { %602 = vperm.xlu0 %1860, %v560_v7   ;;  %v1867_v7 = vld [vmem:[%s2412_s3 + $0x28] sm:$0xff]   ;;  %p1885_p12 = pnand %p1884_p11, %p2077_p5  ;;  %p1892_p2 = por %p1891_p1, %p1890_p0 }
  0x2c   : > { %p1886_p13 = pneg %p1885_p12 }
  0x2d   : > { %627 = vperm.xlu1 %1861, %v565_v17  }
  0x2e   : > { %612 = vperm.xlu0 %1860, %v562_v10   ;;  %v1870_v10 = vld [vmem:[%s2414_s5] sm:$0xff]   ;;  %p1893_p3 = pnand %p1892_p2, %p1886_p13 }
  0x2f   : > { %1753 = vmatprep.mubr.bf16.mxu1 %v1870_v10 }
  0x31   : > { %637 = vperm.xlu1 %1861, %v567_v19  }
  0x32   : > { %622 = vperm.xlu0 %1860, %v564_v12  }
  0x35   : > { %647 = vperm.xlu1 %1861, %v569_v21  }
  0x36   : > { %632 = vperm.xlu0 %1860, %v566_v14  }
  0x39   : > { %961 = vperm.xlu1 %1861, %v954_v23  }
  0x3a   : > { %642 = vperm.xlu0 %1860, %v568_v16  }
  0x3d   : > { %871 = vperm.xlu1 %1861, %v861_v25  }
  0x3e   : > { %866 = vperm.xlu0 %1860, %v860_v18  }
  0x41   : > { %996 = vperm.xlu1 %1861, %v989_v27  }
  0x42   : > { %966 = vperm.xlu0 %1860, %v955_v20  }
  0x45   : > { %971 = vperm.xlu1 %1861, %v956_v29  }
  0x46   : > { %876 = vperm.xlu0 %1860, %v862_v22  }
  0x49   : > { %881 = vperm.xlu1 %1861, %v863_v31  }
  0x4a   : > { %1001 = vperm.xlu0 %1860, %v990_v24  }
  0x4d   : > { %1011 = vperm.xlu1 %1861, %v992_v33  }
  0x4e   : > { %976 = vperm.xlu0 %1860, %v957_v26  }
  0x51   : > { %1016 = vperm.xlu1 %1861, %v993_v35  }
  0x52   : > { %1006 = vperm.xlu0 %1860, %v991_v28  }
  0x55   : > { %1076 = vperm.xlu1 %1861, %v1054_v37  }
  0x56   : > { %981 = vperm.xlu0 %1860, %v958_v30  }
  0x59   : > { %1086 = vperm.xlu1 %1861, %v1056_v39  }
  0x5a   : > { %1071 = vperm.xlu0 %1860, %v1053_v32  }
  0x5d   : > { %1096 = vperm.xlu1 %1861, %v1058_v41  }
  0x5e   : > { %1081 = vperm.xlu0 %1860, %v1055_v34  }
  0x61   : > { %1106 = vperm.xlu1 %1861, %v1060_v43  }
  0x62   : > { %1091 = vperm.xlu0 %1860, %v1057_v36  }
  0x65   : > { %1116 = vperm.xlu1 %1861, %v1062_v45  }
  0x66   : > { %1101 = vperm.xlu0 %1860, %v1059_v38  }
  0x69   : > { %1126 = vperm.xlu1 %1861, %v1064_v47  }
  0x6a   : > { %1111 = vperm.xlu0 %1860, %v1061_v40  }
  0x6d   : > { %1136 = vperm.xlu1 %1861, %v1066_v49  }
  0x6e   : > { %1121 = vperm.xlu0 %1860, %v1063_v42  }
  0x71   : > { %1146 = vperm.xlu1 %1861, %v1068_v51  }
  0x72   : > { %1131 = vperm.xlu0 %1860, %v1065_v44  }
  0x75   : > { %1369 = vperm.xlu1 %1861, %v1359_v53  }
  0x76   : > { %1141 = vperm.xlu0 %1860, %v1067_v46  }
  0x79   : > { %1379 = vperm.xlu1 %1861, %v1361_v55  }
  0x7a   : > { %1364 = vperm.xlu0 %1860, %v1358_v48  }
  0x7d   : > { %1529 = vperm.xlu1 %1861, %v1521_v56  }
  0x7e   : > { %1374 = vperm.xlu0 %1860, %v1360_v50  }
  0x81   : > { %1543 = vperm.xlu1 %1861, %v1535_v57  }
  0x82   : > { %1524 = vperm.xlu0 %1860, %v1520_v52  }
  0x86   : > { %1538 = vperm.xlu0 %1860, %v1534_v54  }
  0x94   : > { %v573_v11 = vpop.permute.xlu1 %572 }
  0x98   : > { %v578_v12 = vpop.permute.xlu1 %577 }
  0x99   : > { %v525_v58 = vpop.permute.xlu0 %524 }
  0x9a   : > { %v527_v60 = vmul.f32 %v525_v58, %v2264_v59 }
  0x9c   : > { %v588_v14 = vpop.permute.xlu1 %587 }
  0x9d   : > { %v532_v61 = vpop.permute.xlu0 %531 }
  0x9e   : > { %v534_v62 = vadd.f32 %v532_v61, %v527_v60 }
  0xa0   : > { %v535_v63 = vmul.f32 0.01, %v534_v62  ;;  %v598_v16 = vpop.permute.xlu1 %597 }
  0xa1   : > { %v583_v13 = vpop.permute.xlu0 %582 }
  0xa2   : > { %v536_v0 = vmax.f32 %v534_v62, %v535_v63 }
  0xa4   : > { %v553_v1 = vpack.c.bf16 %v536_v0, %v536_v0  ;;  %v608_v21 = vpop.permute.xlu1 %607 }
  0xa5   : > { %v593_v15 = vpop.permute.xlu0 %592 }
  0xa6   : > { %1813 = vmatprep.subr.msk.bf16.mxu0 %vm715_vm1, %v553_v1  ;;  %v717_v2 = vsel %vm715_vm1, %v553_v1, 0 }
  0xa7   : > { %1720 = vmatpush3.bf16.msra.mxu0 %v717_v2 }
  0xa8   : > { %v618_v34 = vpop.permute.xlu1 %617 }
  0xa9   : > { %v603_v17 = vpop.permute.xlu0 %602 }
  0xaa   : > { %1722 = vmatmul.mubr.msk.bf16.vlgmr.msra.gmra.mrb[0].mxu0 %vm690_vm0, %v1863_v3 }
  0xab   : > { %1725 = vmatprep.mubr.msk.bf16.mxu0 %vm690_vm0, %v1864_v4 }
  0xac   : > { %v628_v51 = vpop.permute.xlu1 %627 }
  0xad   : > { %v613_v30 = vpop.permute.xlu0 %612 }
  0xb1   : > { %v623_v47 = vpop.permute.xlu0 %622 }
  0xb2   : > { %1726 = vmatmul.mubr.msk.bf16.gmra.mrb[4].mxu0 %vm690_vm0, %v1865_v5  ;;  %v638_v5 = vpop.permute.xlu1 %637 }
  0xb3   : > { %1729 = vmatprep.mubr.msk.bf16.mxu0 %vm690_vm0, %v1866_v6 }
  0xb5   : > { %v633_v62 = vpop.permute.xlu0 %632 }
  0xba   : > { %1730 = vmatmul.mubr.msk.bf16.gmra.mrb[8].mxu0 %vm690_vm0, %v1867_v7 }
  0xbb   : > { %1733 = vmatprep.mubr.msk.bf16.mxu0 %vm690_vm0, %v1868_v8 }
  0xc2   : > { %1734 = vmatmul.mubr.msk.bf16.gmra.mrb[12].mxu0 %vm690_vm0, %v1869_v9 }
 0x17d   : > { %v1723_v18 = vpop.f32.mrb[0].mxu0 }
 0x17e   : > { %v762_v19 = vadd.f32 %v1723_v18, %v583_v13  ;;  %v753_v20 = vpop.f32.mrb[1].mxu0 }
 0x17f   : > { %v754_v22 = vadd.f32 %v753_v20, %v573_v11  ;;  %v1724_v23 = vpop.f32.mrb[2].mxu0 }
 0x180   : > { %v818_v24 = vmul.f32 0.01, %v762_v19  ;;  %v765_v25 = vadd.f32 %v1724_v23, %v588_v14  ;;  %v756_v26 = vpop.f32.mrb[3].mxu0 }
 0x181   : > { %v816_v27 = vmul.f32 0.01, %v754_v22  ;;  %v757_v28 = vadd.f32 %v756_v26, %v578_v12  ;;  %v643_v12 = vpop.permute.xlu0 %642 }
 0x182   : > { %v819_v29 = vmul.f32 0.01, %v765_v25  ;;  %v834_v32 = vmax.f32 %v762_v19, %v818_v24  ;;  %v648_v19 = vpop.permute.xlu1 %647 }
 0x183   : > { %v817_v31 = vmul.f32 0.01, %v757_v28  ;;  %v832_v35 = vmax.f32 %v754_v22, %v816_v27 }
 0x184   : > { %v835_v33 = vmax.f32 %v765_v25, %v819_v29 }
 0x185   : > { %v833_v36 = vmax.f32 %v757_v28, %v817_v31  ;;  %v1727_v37 = vpop.f32.mrb[4].mxu0 }
 0x186   : > { %v778_v38 = vadd.f32 %v1727_v37, %v603_v17  ;;  %v769_v39 = vpop.f32.mrb[5].mxu0  ;;  %v853_v40 = vpack.c.bf16 %v835_v33, %v834_v32  ;;  %v1872_v37 = vld [vmem:[%s2418_s9] sm:$0xff]  }
 0x187   : > { %v770_v41 = vadd.f32 %v769_v39, %v593_v15  ;;  %v1728_v42 = vpop.f32.mrb[6].mxu0  ;;  %v852_v43 = vpack.c.bf16 %v833_v36, %v832_v35  ;;  %v1871_v36 = vld [vmem:[%s2414_s5 + $0x8] sm:$0xff]   ;;  %1763 = vmatprep.mubr.msk.bf16.mxu0 %vm1189_vm2, %v1872_v37  ;;  %v962_v39 = vpop.permute.xlu1 %961 }
 0x188   : > { %v822_v44 = vmul.f32 0.01, %v778_v38  ;;  %v781_v45 = vadd.f32 %v1728_v42, %v608_v21  ;;  %v772_v46 = vpop.f32.mrb[7].mxu0 }
 0x189   : > { %v820_v48 = vmul.f32 0.01, %v770_v41  ;;  %v773_v49 = vadd.f32 %v772_v46, %v598_v16  ;;  %1737 = vmatprep.subr.bf16.mxu1 %v852_v43 }
 0x18a   : > { %v823_v50 = vmul.f32 0.01, %v781_v45  ;;  %1738 = vmatpush3.bf16.msra.mxu1 %v852_v43  ;;  %v838_v53 = vmax.f32 %v778_v38, %v822_v44  ;;  %v867_v38 = vpop.permute.xlu0 %866 }
 0x18b   : > { %v821_v52 = vmul.f32 0.01, %v773_v49  ;;  %1739 = vmatprep.subr.bf16.mxu1 %v853_v40  ;;  %v836_v55 = vmax.f32 %v770_v41, %v820_v48  ;;  %v872_v41 = vpop.permute.xlu1 %871 }
 0x18c   : > { %v839_v54 = vmax.f32 %v781_v45, %v823_v50 }
 0x18d   : > { %v837_v56 = vmax.f32 %v773_v49, %v821_v52  ;;  %v1731_v57 = vpop.f32.mrb[8].mxu0  ;;  %v984_v49 = vmul.f32 %v962_v39, %v2264_v59 }
 0x18e   : > { %v794_v58 = vadd.f32 %v1731_v57, %v623_v47  ;;  %v785_v60 = vpop.f32.mrb[9].mxu0  ;;  %1740 = vmatpush3.bf16.msra.mxu1 %v853_v40  ;;  %v855_v61 = vpack.c.bf16 %v839_v54, %v838_v53  ;;  %v967_v40 = vpop.permute.xlu0 %966 }
 0x18f   : > { %v786_v63 = vadd.f32 %v785_v60, %v613_v30  ;;  %v1732_v0 = vpop.f32.mrb[10].mxu0  ;;  %v854_v1 = vpack.c.bf16 %v837_v56, %v836_v55  ;;  %v997_v43 = vpop.permute.xlu1 %996 }
 0x190   : > { %v826_v2 = vmul.f32 0.01, %v794_v58  ;;  %v797_v3 = vadd.f32 %v1732_v0, %v628_v51  ;;  %v788_v4 = vpop.f32.mrb[11].mxu0  ;;  %v1019_v54 = vadd.f32 %v997_v43, %v984_v49 }
 0x191   : > { %v824_v6 = vmul.f32 0.01, %v786_v63  ;;  %v789_v7 = vadd.f32 %v788_v4, %v618_v34  ;;  %1741 = vmatprep.subr.bf16.mxu1 %v854_v1 }
 0x192   : > { %v827_v8 = vmul.f32 0.01, %v797_v3  ;;  %1742 = vmatpush3.bf16.msra.mxu1 %v854_v1  ;;  %v842_v10 = vmax.f32 %v794_v58, %v826_v2  ;;  %v877_v42 = vpop.permute.xlu0 %876  ;;  %v1024_v2 = vmul.f32 0.01, %v1019_v54 }
 0x193   : > { %v825_v9 = vmul.f32 0.01, %v789_v7  ;;  %1743 = vmatprep.subr.bf16.mxu1 %v855_v61  ;;  %v840_v13 = vmax.f32 %v786_v63, %v824_v6  ;;  %v972_v45 = vpop.permute.xlu1 %971 }
 0x194   : > { %v843_v11 = vmax.f32 %v797_v3, %v827_v8 }
 0x195   : > { %v841_v14 = vmax.f32 %v789_v7, %v825_v9  ;;  %v1735_v15 = vpop.f32.mrb[12].mxu0 }
 0x196   : > { %v810_v16 = vadd.f32 %v1735_v15, %v643_v12  ;;  %v801_v17 = vpop.f32.mrb[13].mxu0  ;;  %1744 = vmatpush3.bf16.msra.mxu1 %v855_v61  ;;  %v857_v18 = vpack.c.bf16 %v843_v11, %v842_v10  ;;  %v1002_v44 = vpop.permute.xlu0 %1001  ;;  %v1029_v11 = vmax.f32 %v1019_v54, %v1024_v2 }
 0x197   : > { %v802_v20 = vadd.f32 %v801_v17, %v633_v62  ;;  %v1736_v21 = vpop.f32.mrb[14].mxu0  ;;  %v856_v22 = vpack.c.bf16 %v841_v14, %v840_v13  ;;  %v882_v47 = vpop.permute.xlu1 %881 }
 0x198   : > { %v830_v23 = vmul.f32 0.01, %v810_v16  ;;  %v813_v24 = vadd.f32 %v1736_v21, %v648_v19  ;;  %v804_v25 = vpop.f32.mrb[15].mxu0 }
 0x199   : > { %v828_v26 = vmul.f32 0.01, %v802_v20  ;;  %v805_v27 = vadd.f32 %v804_v25, %v638_v5  ;;  %1745 = vmatprep.subr.bf16.mxu1 %v856_v22 }
 0x19a   : > { %v831_v28 = vmul.f32 0.01, %v813_v24  ;;  %1746 = vmatpush3.bf16.msra.mxu1 %v856_v22  ;;  %v846_v30 = vmax.f32 %v810_v16, %v830_v23  ;;  %v977_v46 = vpop.permute.xlu0 %976  ;;  %v1873_v22 = vld [vmem:[%s2418_s9 + $0x8] sm:$0xff]   ;;  %v1874_v23 = vld [vmem:[%s2418_s9 + $0x10] sm:$0xff]  }
 0x19b   : > { %v829_v29 = vmul.f32 0.01, %v805_v27  ;;  %1747 = vmatprep.subr.bf16.mxu1 %v857_v18  ;;  %v844_v32 = vmax.f32 %v802_v20, %v828_v26  ;;  %v1012_v50 = vpop.permute.xlu1 %1011  ;;  %v1875_v26 = vld [vmem:[%s2418_s9 + $0x18] sm:$0xff]  }
 0x19c   : > { %v847_v31 = vmax.f32 %v813_v24, %v831_v28  ;;  %v1948_v24 = vmov 0.0   ;;  %v1878_v28 = vld [vmem:[%s2418_s9 + $0x30] sm:$0xff]  }
 0x19d   : > { %v845_v33 = vmax.f32 %v805_v27, %v829_v29  ;;  %v1876_v27 = vld [vmem:[%s2418_s9 + $0x20] sm:$0xff]   ;;  %v1879_v29 = vld [vmem:[%s2418_s9 + $0x38] sm:$0xff]  }
 0x19e   : > { %1748 = vmatpush3.bf16.msra.mxu1 %v857_v18  ;;  %v859_v34 = vpack.c.bf16 %v847_v31, %v846_v30  ;;  %v1007_v48 = vpop.permute.xlu0 %1006  ;;  %v1880_v30 = vld [vmem:[%s2420_s11] sm:$0xff]  }
 0x19f   : > { %v858_v35 = vpack.c.bf16 %v845_v33, %v844_v32  ;;  %v1017_v3 = vpop.permute.xlu1 %1016 }
 0x1a1   : > { %1749 = vmatprep.subr.bf16.mxu1 %v858_v35 }
 0x1a2   : > { %1750 = vmatpush3.bf16.msra.mxu1 %v858_v35  ;;  %v982_v61 = vpop.permute.xlu0 %981 }
 0x1a3   : > { %1751 = vmatprep.subr.bf16.mxu1 %v859_v34  ;;  %v1077_v32 = vpop.permute.xlu1 %1076 }
 0x1a6   : > { %1752 = vmatpush3.bf16.msra.mxu1 %v859_v34  ;;  %v1072_v31 = vpop.permute.xlu0 %1071 }
 0x1a7   : > { %v1087_v34 = vpop.permute.xlu1 %1086 }
 0x1a9   : > { %1754 = vmatmul.mubr.bf16.vlgmr.msra.gmra.mrb[0].mxu1 %v1871_v36 }
 0x1aa   : > { %1795 = vmatprep.mubr.bf16.mxu1 %v1880_v30  ;;  %v1082_v33 = vpop.permute.xlu0 %1081 }
 0x1ab   : > { %v1097_v36 = vpop.permute.xlu1 %1096 }
 0x1ae   : > { %v1092_v35 = vpop.permute.xlu0 %1091 }
 0x1b2   : > { %v1102_v37 = vpop.permute.xlu0 %1101 }
 0x27c   : > { %v1755_v51 = vpop.f32.mrb[0].mxu1 }
 0x27d   : > { %v939_v52 = vadd.f32 %v1755_v51, %v877_v42  ;;  %v930_v53 = vpop.f32.mrb[1].mxu1 }
 0x27e   : > { %v931_v55 = vadd.f32 %v930_v53, %v867_v38  ;;  %v1756_v56 = vpop.f32.mrb[2].mxu1 }
 0x27f   : > { %v987_v57 = vmul.f32 %v977_v46, %v939_v52  ;;  %v2308_v58 = vadd.f32 %v1756_v56, %v882_v47  ;;  %v933_v60 = vpop.f32.mrb[3].mxu1 }
 0x280   : > { %v985_v62 = vmul.f32 %v967_v40, %v931_v55  ;;  %v934_v63 = vadd.f32 %v933_v60, %v872_v41  ;;  %v1458_v25 = vpack.c.bf16 %v931_v55, %v2264_v59  ;;  %v1877_v59 = vld [vmem:[%s2418_s9 + $0x28] sm:$0xff]   ;;  %v1107_v41 = vpop.permute.xlu1 %1106 }
 0x281   : > { %v1022_v0 = vadd.f32 %v1012_v50, %v987_v57  ;;  %v988_v1 = vmul.f32 %v982_v61, %v2308_v58  ;;  %v1112_v50 = vpop.permute.xlu0 %1111 }
 0x282   : > { %v1020_v4 = vadd.f32 %v1002_v44, %v985_v62  ;;  %v986_v5 = vmul.f32 %v972_v45, %v934_v63  ;;  %v1459_v6 = vpack.c.bf16 %v939_v52, %v934_v63 }
 0x283   : > { %v1023_v7 = vadd.f32 %v1017_v3, %v988_v1  ;;  %v1027_v8 = vmul.f32 0.01, %v1022_v0 }
 0x284   : > { %v1025_v9 = vmul.f32 0.01, %v1020_v4  ;;  %v1021_v10 = vadd.f32 %v1007_v48, %v986_v5  ;;  %v1117_v54 = vpop.permute.xlu1 %1116 }
 0x285   : > { %v1028_v12 = vmul.f32 0.01, %v1023_v7  ;;  %v1032_v17 = vmax.f32 %v1022_v0, %v1027_v8  ;;  %v1122_v5 = vpop.permute.xlu0 %1121 }
 0x286   : > { %v1026_v13 = vmul.f32 0.01, %v1021_v10  ;;  %v1030_v14 = vmax.f32 %v1020_v4, %v1025_v9 }
 0x287   : > { %v1033_v18 = vmax.f32 %v1023_v7, %v1028_v12 }
 0x288   : > { %v1050_v15 = vpack.c.bf16 %v1030_v14, %v1029_v11  ;;  %v1031_v16 = vmax.f32 %v1021_v10, %v1026_v13  ;;  %v1127_v9 = vpop.permute.xlu1 %1126 }
 0x289   : > { %v1052_v20 = vpack.c.bf16 %v1033_v18, %v1033_v18 }
 0x28a   : > { %1757 = vmatprep.subr.bf16.mxu0 %v1050_v15  ;;  %v1051_v19 = vpack.c.bf16 %v1032_v17, %v1031_v16 }
 0x28b   : > { %1758 = vmatpush3.bf16.msra.mxu0 %v1050_v15  ;;  %v1215_v21 = vsel %vm715_vm1, %v1052_v20, 0 }
 0x28c   : > { %1759 = vmatprep.subr.bf16.mxu0 %v1051_v19 }
 0x28f   : > { %1760 = vmatpush3.bf16.msra.mxu0 %v1051_v19  ;;  %v1132_v19 = vpop.permute.xlu0 %1131 }
 0x290   : > { %1814 = vmatprep.subr.msk.bf16.mxu0 %vm715_vm1, %v1052_v20 }
 0x293   : > { %1762 = vmatpush3.bf16.msra.mxu0 %v1215_v21 }
 0x294   : > { %1799 = vmatprep.subr.bf16.mxu0 %v1948_v24 }
 0x296   : > { %1764 = vmatmul.mubr.msk.bf16.vlgmr.msra.gmra.mrb[16].mxu0 %vm1189_vm2, %v1873_v22 }
 0x297   : > { %1800 = vmatpush3.bf16.msra.mxu0 %v1458_v25  ;;  %1767 = vmatprep.mubr.msk.bf16.mxu0 %vm1189_vm2, %v1874_v23 }
 0x298   : > { %1801 = vmatprep.subr.bf16.mxu0 %v1948_v24 }
 0x29b   : > { %1802 = vmatpush3.bf16.msra.mxu0 %v1459_v6 }
 0x29c   : > { %1803 = vmatprep.subr.bf16.mxu0 %v1948_v24 }
 0x29e   : > { %1768 = vmatmul.mubr.msk.bf16.gmra.mrb[20].mxu0 %vm1189_vm2, %v1875_v26 }
 0x29f   : > { %1771 = vmatprep.mubr.msk.bf16.mxu0 %vm1189_vm2, %v1876_v27  ;;  %v1137_v27 = vpop.permute.xlu1 %1136 }
 0x2a6   : > { %1772 = vmatmul.mubr.msk.bf16.gmra.mrb[24].mxu0 %vm1189_vm2, %v1877_v59 }
 0x2a7   : > { %1775 = vmatprep.mubr.msk.bf16.mxu0 %vm1189_vm2, %v1878_v28 }
 0x2ae   : > { %1776 = vmatmul.mubr.msk.bf16.gmra.mrb[28].mxu0 %vm1189_vm2, %v1879_v29 }
 0x2af   : > { %1809 = vmatprep.mubr.msk.bf16.mxu0 %vm1949_vm3, %v1948_v24 }
 0x369   : > { %v1765_v38 = vpop.f32.mrb[16].mxu0 }
 0x36a   : > { %v1260_v39 = vadd.f32 %v1765_v38, %v1082_v33  ;;  %v1251_v40 = vpop.f32.mrb[17].mxu0  ;;  %v1142_v33 = vpop.permute.xlu0 %1141 }
 0x36b   : > { %v1252_v42 = vadd.f32 %v1251_v40, %v1072_v31  ;;  %v1766_v43 = vpop.f32.mrb[18].mxu0  ;;  %v1147_v40 = vpop.permute.xlu1 %1146 }
 0x36c   : > { %v1316_v44 = vmul.f32 0.01, %v1260_v39  ;;  %v1263_v45 = vadd.f32 %v1766_v43, %v1087_v34  ;;  %v1254_v46 = vpop.f32.mrb[19].mxu0 }
 0x36d   : > { %v1314_v47 = vmul.f32 0.01, %v1252_v42  ;;  %v1255_v48 = vadd.f32 %v1254_v46, %v1077_v32 }
 0x36e   : > { %v1317_v49 = vmul.f32 0.01, %v1263_v45  ;;  %v1332_v52 = vmax.f32 %v1260_v39, %v1316_v44 }
 0x36f   : > { %v1315_v51 = vmul.f32 0.01, %v1255_v48  ;;  %v1330_v55 = vmax.f32 %v1252_v42, %v1314_v47 }
 0x370   : > { %v1333_v53 = vmax.f32 %v1263_v45, %v1317_v49 }
 0x371   : > { %v1331_v56 = vmax.f32 %v1255_v48, %v1315_v51  ;;  %v1769_v57 = vpop.f32.mrb[20].mxu0 }
 0x372   : > { %v1276_v60 = vadd.f32 %v1769_v57, %v1102_v37  ;;  %v1267_v61 = vpop.f32.mrb[21].mxu0  ;;  %v1351_v62 = vpack.c.bf16 %v1333_v53, %v1332_v52  ;;  %v1881_v57 = vld [vmem:[%s2420_s11 + $0x8] sm:$0xff]  }
 0x373   : > { %v1268_v63 = vadd.f32 %v1267_v61, %v1092_v35  ;;  %v1770_v0 = vpop.f32.mrb[22].mxu0  ;;  %v1350_v1 = vpack.c.bf16 %v1331_v56, %v1330_v55  ;;  %v1370_v61 = vpop.permute.xlu1 %1369 }
 0x374   : > { %v1320_v2 = vmul.f32 0.01, %v1276_v60  ;;  %v1279_v3 = vadd.f32 %v1770_v0, %v1107_v41  ;;  %v1270_v4 = vpop.f32.mrb[23].mxu0 }
 0x375   : > { %v1318_v6 = vmul.f32 0.01, %v1268_v63  ;;  %v1271_v7 = vadd.f32 %v1270_v4, %v1097_v36  ;;  %1779 = vmatprep.subr.bf16.mxu1 %v1350_v1 }
 0x376   : > { %v1321_v8 = vmul.f32 0.01, %v1279_v3  ;;  %1780 = vmatpush3.bf16.msra.mxu1 %v1350_v1  ;;  %v1336_v11 = vmax.f32 %v1276_v60, %v1320_v2  ;;  %v1365_v60 = vpop.permute.xlu0 %1364 }
 0x377   : > { %v1319_v10 = vmul.f32 0.01, %v1271_v7  ;;  %1781 = vmatprep.subr.bf16.mxu1 %v1351_v62  ;;  %v1334_v13 = vmax.f32 %v1268_v63, %v1318_v6  ;;  %v1380_v4 = vpop.permute.xlu1 %1379 }
 0x378   : > { %v1337_v12 = vmax.f32 %v1279_v3, %v1321_v8 }
 0x379   : > { %v1335_v14 = vmax.f32 %v1271_v7, %v1319_v10  ;;  %v1773_v15 = vpop.f32.mrb[24].mxu0 }
 0x37a   : > { %v1292_v16 = vadd.f32 %v1773_v15, %v1122_v5  ;;  %v1283_v17 = vpop.f32.mrb[25].mxu0  ;;  %1782 = vmatpush3.bf16.msra.mxu1 %v1351_v62  ;;  %v1353_v18 = vpack.c.bf16 %v1337_v12, %v1336_v11  ;;  %v1375_v2 = vpop.permute.xlu0 %1374  ;;  %v1882_v12 = vld [vmem:[%s2422_s13] sm:$0xff]  }
 0x37b   : > { %v1284_v20 = vadd.f32 %v1283_v17, %v1112_v50  ;;  %v1774_v21 = vpop.f32.mrb[26].mxu0  ;;  %v1352_v22 = vpack.c.bf16 %v1335_v14, %v1334_v13 }
 0x37c   : > { %v1324_v23 = vmul.f32 0.01, %v1292_v16  ;;  %v1295_v25 = vadd.f32 %v1774_v21, %v1127_v9  ;;  %v1286_v26 = vpop.f32.mrb[27].mxu0 }
 0x37d   : > { %v1322_v59 = vmul.f32 0.01, %v1284_v20  ;;  %v1287_v28 = vadd.f32 %v1286_v26, %v1117_v54  ;;  %1783 = vmatprep.subr.bf16.mxu1 %v1352_v22 }
 0x37e   : > { %v1325_v29 = vmul.f32 0.01, %v1295_v25  ;;  %1784 = vmatpush3.bf16.msra.mxu1 %v1352_v22  ;;  %v1340_v31 = vmax.f32 %v1292_v16, %v1324_v23  ;;  %v1530_v16 = vpop.permute.xlu1 %1529 }
 0x37f   : > { %v1323_v30 = vmul.f32 0.01, %v1287_v28  ;;  %1785 = vmatprep.subr.bf16.mxu1 %v1353_v18  ;;  %v1338_v34 = vmax.f32 %v1284_v20, %v1322_v59 }
 0x380   : > { %v1341_v32 = vmax.f32 %v1295_v25, %v1325_v29 }
 0x381   : > { %v1339_v35 = vmax.f32 %v1287_v28, %v1323_v30  ;;  %v1777_v36 = vpop.f32.mrb[28].mxu0 }
 0x382   : > { %v1308_v37 = vadd.f32 %v1777_v36, %v1142_v33  ;;  %v1299_v38 = vpop.f32.mrb[29].mxu0  ;;  %1786 = vmatpush3.bf16.msra.mxu1 %v1353_v18  ;;  %v1355_v39 = vpack.c.bf16 %v1341_v32, %v1340_v31  ;;  %v1544_v26 = vpop.permute.xlu1 %1543 }
 0x383   : > { %v1300_v41 = vadd.f32 %v1299_v38, %v1132_v19  ;;  %v1778_v42 = vpop.f32.mrb[30].mxu0  ;;  %v1354_v43 = vpack.c.bf16 %v1339_v35, %v1338_v34 }
 0x384   : > { %v1328_v44 = vmul.f32 0.01, %v1308_v37  ;;  %v1311_v45 = vadd.f32 %v1778_v42, %v1147_v40  ;;  %v1302_v46 = vpop.f32.mrb[31].mxu0 }
 0x385   : > { %v1326_v47 = vmul.f32 0.01, %v1300_v41  ;;  %v1303_v48 = vadd.f32 %v1302_v46, %v1137_v27  ;;  %1787 = vmatprep.subr.bf16.mxu1 %v1354_v43 }
 0x386   : > { %v1329_v49 = vmul.f32 0.01, %v1311_v45  ;;  %1788 = vmatpush3.bf16.msra.mxu1 %v1354_v43  ;;  %v1344_v51 = vmax.f32 %v1308_v37, %v1328_v44 }
 0x387   : > { %v1327_v50 = vmul.f32 0.01, %v1303_v48  ;;  %1789 = vmatprep.subr.bf16.mxu1 %v1355_v39  ;;  %v1342_v53 = vmax.f32 %v1300_v41, %v1326_v47 }
 0x388   : > { %v1345_v52 = vmax.f32 %v1311_v45, %v1329_v49 }
 0x389   : > { %v1343_v54 = vmax.f32 %v1303_v48, %v1327_v50 }
 0x38a   : > { %1790 = vmatpush3.bf16.msra.mxu1 %v1355_v39  ;;  %v1357_v55 = vpack.c.bf16 %v1345_v52, %v1344_v51 }
 0x38b   : > { %v1356_v56 = vpack.c.bf16 %v1343_v54, %v1342_v53 }
 0x38d   : > { %1791 = vmatprep.subr.bf16.mxu1 %v1356_v56 }
 0x38e   : > { %1792 = vmatpush3.bf16.msra.mxu1 %v1356_v56 }
 0x38f   : > { %1793 = vmatprep.subr.bf16.mxu1 %v1357_v55 }
 0x392   : > { %1794 = vmatpush3.bf16.msra.mxu1 %v1357_v55 }
 0x395   : > { %1796 = vmatmul.mubr.bf16.vlgmr.msra.gmra.mrb[4].mxu1 %v1881_v57 }
 0x468   : > { %v1797_v62 = vpop.f32.mrb[4].mxu1 }
 0x469   : > { %v1428_v63 = vpop.f32.mrb[5].mxu1  ;;  %v1437_v5 = vadd.f32 %v1797_v62, %v1375_v2 }
 0x46a   : > { %v1429_v0 = vadd.f32 %v1428_v63, %v1365_v60  ;;  %v1798_v1 = vpop.f32.mrb[6].mxu1 }
 0x46b   : > { %v1431_v3 = vpop.f32.mrb[7].mxu1  ;;  %v1440_v8 = vadd.f32 %v1798_v1, %v1380_v4 }
 0x46c   : > { %v1460_v6 = vpack.c.bf16 %v1429_v0, %v2308_v58  ;;  %v1432_v7 = vadd.f32 %v1431_v3, %v1370_v61  ;;  %v1525_v58 = vpop.permute.xlu0 %1524 }
 0x46d   : > { %v1462_v10 = vpack.c.bf16 %v1440_v8, %v1440_v8 }
 0x46e   : > { %v1461_v9 = vpack.c.bf16 %v1437_v5, %v1432_v7  ;;  %1804 = vmatpush3.bf16.msra.mxu0 %v1460_v6 }
 0x46f   : > { %1805 = vmatprep.subr.bf16.mxu0 %v1948_v24  ;;  %v1473_v11 = vsel %vm715_vm1, %v1462_v10, 0 }
 0x470   : > { %v1539_v22 = vpop.permute.xlu0 %1538 }
 0x472   : > { %1806 = vmatpush3.bf16.msra.mxu0 %v1461_v9 }
 0x473   : > { %1807 = vmatprep.subr.bf16.mxu0 %v1948_v24 }
 0x476   : > { %1808 = vmatpush3.bf16.msra.mxu0 %v1473_v11 }
 0x479   : > { %1810 = vmatmul.mubr.msk.bf16.vlgmr.msra.gmra.mrb[32].mxu0 %vm1468_vm4, %v1882_v12 }
 0x54c   : > { %v1509_v13 = vpop.f32.mrb[32].mxu0 }
 0x54d   : > { %v1516_v14 = vmul.f32 0.01, %v1509_v13  ;;  %v1811_v15 = vpop.f32.mrb[33].mxu0 }
 0x54e   : > { %v1512_v17 = vpop.f32.mrb[34].mxu0 }
 0x54f   : > { %v1518_v18 = vmax.f32 %v1509_v13, %v1516_v14  ;;  %v1517_v24 = vmul.f32 0.01, %v1512_v17  ;;  %v1812_v19 = vpop.f32.mrb[35].mxu0 }
 0x551   : > { %v1532_v20 = vmul.f32 %v1525_v58, %v1518_v18  ;;  %v1519_v21 = vmax.f32 %v1512_v17, %v1517_v24 }
 0x553   : > { %v1546_v23 = vadd.f32 %v1539_v22, %v1532_v20  ;;  %v1533_v25 = vmul.f32 %v1530_v16, %v1519_v21 }
 0x555   : > { %1548 = vst [vmem:[%s512_s30] sm:$0xff] %v1546_v23  ;;  %v1547_v27 = vadd.f32 %v1544_v26, %v1533_v25 }
 0x557   : > { %1549 = vst [vmem:[%s512_s30 + $0x8] sm:$0xff] %v1547_v27 }
 0x558   : > { %1896 = shalt.err (!%p1893_p3)
}
 0x559   : > { %s1897_s29 = scalar_lea.hbm %s2366_s27, 256  ;;  %s1901_s1 = scalar_lea.hbm %s2425_s16, 512 }
 0x55a   : > { %p1898_p4 = scmp.ne.s32.totalorder %s2366_s27, %s1897_s29  ;;  %p1902_p9 = scmp.lt.u32.totalorder %s2366_s27, %s2425_s16 }
 0x55b   : > { %p1903_p10 = scmp.lt.u32.totalorder %s1901_s1, %s1897_s29  ;;  %p1905_p12 = scmp.lt.u32.totalorder %s1897_s29, %s2366_s27 }
 0x55c   : > { %p1899_p7 = pnand %p1898_p4, %p2077_p5 }
 0x55d   : > { %p1904_p11 = por %p1903_p10, %p1902_p9 }
 0x55e   : > { %p1900_p8 = pneg %p1899_p7 }
 0x55f   : > { %p1906_p13 = por %p1905_p12, %p1904_p11 }
 0x561   : > { %p1907_p0 = pnand %p1906_p13, %p1900_p8 }
 0x563   : > { %1910 = shalt.err (!%p1907_p0)
}
 0x564   : > { %s1951_s25 = smov 128   ;;  %s1952_s28 = smov 256  }
 0x565   : > { %s1953_s23 = smov 8  }
 0x566   : > { %1815 = dma.vmem_to_hbm [thread:$0]  (%p2077_p5), %s2361_s18, 256, %s2366_s27, %s2368_s20, %s1951_s25, %s1952_s28, %s1953_s23  }
 0x567 PF: > { %p1821_p1 = scmp.ge.s32.totalorder %s1945_s24, 2  ;;  %s1578_s30 = sand.u32 1, %s1933_s21  }
 0x568   : > { %s1579_s29 = scalar_lea.sflag [#allocation4], %s1578_s30 }
 0x569   : > { %p1818_p2 = pnand %p1821_p1, %p2081_p6 }
 0x56b   : > { %1928 = dma.done.wait (!%p1818_p2), %s1579_s29, 256  }
 0x56c   : > { %1930 = vsyncadd (!%p1818_p2), %s1579_s29, 4294967040  ;;  %s2440_s24 = sld [smem:[#allocation7_spill]]  ;;  %s2441_s19 = sld [smem:[#allocation6_spill]] }
 0x56d   : > { %s2442_s23 = sld [smem:[#allocation8_spill]]  ;;  %s2443_s21 = smov %s1937_s22 }
 0x572   : > { %p26_p3 = scmp.ge.s32.totalorder %s2440_s24, 4   ;;  %s2444_s22 = smov %s2441_s19 }
 0x574   :  { %28 = sbr.rel (!%p26_p3) target bundleno = 7 (0x7), region = 119 }
 0x57b   :  { %1584 = vsyncpa [#allocation4], 1 }
 0x57c   :  { %1586 = vsyncpa [#allocation4 + $0x1], 1 }

</bundles_post_ra>
